<compile_context>
chip_gen: v7x
topology: tpu7x:2x2x1
jax: 0.10.0
libtpu: 0.0.40
codegen_flags: <defaults>
</compile_context>

<pallas_src>
import jax
import jax.numpy as jnp
from jax.experimental import pallas as pl
from jax.experimental.pallas import tpu as pltpu

LANE = 128
MAX_TILE_ROWS = 512  # lane-packed rows per grid step (512*128*4B = 256 KiB/block)


def _affine_noise_kernel(noise_ref, mean_ref, std_ref, out_ref):
    # noise_ref/out_ref: (tile_r, width); mean_ref/std_ref: (1, width).
    out_ref[...] = mean_ref[...] + noise_ref[...] * std_ref[...]


def random_init(mean, log_std, n_slots, batch_size, key):
    """mean, log_std: (1, 1, dim) float32.  Returns (batch_size, n_slots, dim) f32."""
    _, _, dim = mean.shape
    rows = batch_size * n_slots
    total = rows * dim

    # N(0,1) noise, identical semantics to torch.randn(B, n_slots, dim).
    noise = jax.random.normal(key, (batch_size, n_slots, dim), dtype=jnp.float32)

    mean1d = mean.reshape(dim).astype(jnp.float32)
    std1d = jnp.exp(log_std.reshape(dim)).astype(jnp.float32)

    if (LANE % dim == 0) and (total % LANE == 0):
        # Lane-dense path: pack 128//dim consecutive (b, slot) vectors per row.
        reps = LANE // dim
        packed_rows = total // LANE
        width = LANE
        noise2d = noise.reshape(packed_rows, width)
        mean2d = jnp.tile(mean1d, (reps,)).reshape(1, width)
        std2d = jnp.tile(std1d, (reps,)).reshape(1, width)
    else:
        # Fallback: plain (rows, dim) slab.
        packed_rows = rows
        width = dim
        noise2d = noise.reshape(packed_rows, width)
        mean2d = mean1d.reshape(1, width)
        std2d = std1d.reshape(1, width)

    if packed_rows <= MAX_TILE_ROWS:
        tile_r = packed_rows            # single block == full array (shape-legal)
        grid = (1,)
    else:
        tile_r = MAX_TILE_ROWS          # divisible by 8; width is 128 here
        grid = (pl.cdiv(packed_rows, tile_r),)

    # Double-buffered noise + output blocks, plus params and headroom.
    block_bytes = tile_r * width * 4
    vmem_limit = min(max(8 * block_bytes, 8 * 1024 * 1024), 32 * 1024 * 1024)

    out2d = pl.pallas_call(
        _affine_noise_kernel,
        out_shape=jax.ShapeDtypeStruct((packed_rows, width), jnp.float32),
        grid=grid,
        in_specs=[
            pl.BlockSpec((tile_r, width), lambda i: (i, 0)),   # noise
            pl.BlockSpec((1, width), lambda i: (0, 0)),        # mean (resident)
            pl.BlockSpec((1, width), lambda i: (0, 0)),        # std  (resident)
        ],
        out_specs=pl.BlockSpec((tile_r, width), lambda i: (i, 0)),
        compiler_params=pltpu.CompilerParams(
            dimension_semantics=("parallel",),
            vmem_limit_bytes=vmem_limit,
        ),
    )(noise2d, mean2d, std2d)

    return out2d.reshape(batch_size, n_slots, dim)


if __name__ == "__main__":
    # Module hyperparameters (small, consistent with the module's __init__).
    n_slots = 8
    dim = 32
    batch_size = 2

    # Deterministic parameter initialization (exactly what __init__ does).
    initial_std = dim ** (-0.5)
    mean = jnp.zeros((1, 1, dim), dtype=jnp.float32)
    log_std = jnp.log(jnp.ones((1, 1, dim), dtype=jnp.float32) * initial_std)

    key = jax.random.PRNGKey(0)

    slots = random_init(mean, log_std, n_slots, batch_size, key)
    slots = jax.block_until_ready(slots)

    assert slots.shape == (batch_size, n_slots, dim), slots.shape
    assert slots.dtype == jnp.float32
    assert bool(jnp.all(jnp.isfinite(slots)))

    # Reference check: same key -> same noise -> exact forward-pass semantics.
    ref_noise = jax.random.normal(key, (batch_size, n_slots, dim), dtype=jnp.float32)
    ref = mean + ref_noise * jnp.exp(log_std)
    assert bool(jnp.allclose(slots, ref, rtol=1e-6, atol=1e-6))

    print("KERNEL_OK")
</pallas_src>

<mosaic_0001>
module attributes {stable_mosaic.version = 11 : i64} {
  func.func @_affine_noise_kernel(%arg0: i32, %arg1: memref<4x128xf32, #tpu.memory_space<vmem>>, %arg2: memref<1x128xf32, #tpu.memory_space<vmem>>, %arg3: memref<1x128xf32, #tpu.memory_space<vmem>>, %arg4: memref<4x128xf32, #tpu.memory_space<vmem>>) attributes {dimension_semantics = [#tpu.dimension_semantics<parallel>], iteration_bounds = array<i64: 1>, scalar_prefetch = 0 : i64, scratch_operands = 0 : i64, tpu.core_type = #tpu.core_type<tc>, window_params = [{transform_indices = @transform_0, window_bounds = array<i64: 4, 128>}, {pipeline_mode = #tpu.pipeline_mode<synchronous>, transform_indices = @transform_1, window_bounds = array<i64: 1, 128>}, {pipeline_mode = #tpu.pipeline_mode<synchronous>, transform_indices = @transform_2, window_bounds = array<i64: 1, 128>}, {transform_indices = @transform_3, window_bounds = array<i64: 4, 128>}]} {
    %c0 = arith.constant 0 : index
    %c0_0 = arith.constant 0 : index
    %0 = vector.load %arg2[%c0, %c0_0] : memref<1x128xf32, #tpu.memory_space<vmem>>, vector<1x128xf32>
    %c0_1 = arith.constant 0 : index
    %c0_2 = arith.constant 0 : index
    %1 = vector.load %arg1[%c0_1, %c0_2] : memref<4x128xf32, #tpu.memory_space<vmem>>, vector<4x128xf32>
    %c0_3 = arith.constant 0 : index
    %c0_4 = arith.constant 0 : index
    %2 = vector.load %arg3[%c0_3, %c0_4] : memref<1x128xf32, #tpu.memory_space<vmem>>, vector<1x128xf32>
    %3 = vector.broadcast %2 : vector<1x128xf32> to vector<4x128xf32>
    %4 = arith.mulf %1, %3 : vector<4x128xf32>
    %5 = vector.broadcast %0 : vector<1x128xf32> to vector<4x128xf32>
    %6 = arith.addf %5, %4 : vector<4x128xf32>
    %c0_5 = arith.constant 0 : index
    %c0_6 = arith.constant 0 : index
    %7 = vector.load %arg4[%c0_5, %c0_6] : memref<4x128xf32, #tpu.memory_space<vmem>>, vector<4x128xf32>
    tpu.vector_store %arg4[%c0_5, %c0_6], %6 {strides = array<i32>} : memref<4x128xf32, #tpu.memory_space<vmem>>, vector<4x128xf32>,
    return
  }
  func.func @transform_0(%arg0: i32) -> (i32, i32) {
    %c0_i32 = arith.constant 0 : i32
    %c0_i32_0 = arith.constant 0 : i32
    return %arg0, %c0_i32 : i32, i32
  }
  func.func @transform_1(%arg0: i32) -> (i32, i32) {
    %c0_i32 = arith.constant 0 : i32
    %c0_i32_0 = arith.constant 0 : i32
    %c0_i32_1 = arith.constant 0 : i32
    return %c0_i32, %c0_i32_0 : i32, i32
  }
  func.func @transform_2(%arg0: i32) -> (i32, i32) {
    %c0_i32 = arith.constant 0 : i32
    %c0_i32_0 = arith.constant 0 : i32
    %c0_i32_1 = arith.constant 0 : i32
    return %c0_i32, %c0_i32_0 : i32, i32
  }
  func.func @transform_3(%arg0: i32) -> (i32, i32) {
    %c0_i32 = arith.constant 0 : i32
    %c0_i32_0 = arith.constant 0 : i32
    return %arg0, %c0_i32 : i32, i32
  }
}

</mosaic_0001>

<bundles_post_ra>
// kernel: tpu_custom_call.1
= control target key start
LH: loop header
LB: loop body
LE: loop exit
PB: predicated region body
PF: predicated region fallthrough
CT: control target
= control target key end

     0   :  { %8 = vsyncpa [#allocation3], 0  ;;  %s164_s0 = inlined_call_operand.hbm [shape: f32[4,128], index: 0, kind: input, shape index: {}]   ;;  %s165_s1 = inlined_call_operand.vmem [shape: f32[1,128], index: 1, kind: input, shape index: {}]   ;;  %s166_s2 = inlined_call_operand.vmem [shape: f32[1,128], index: 2, kind: input, shape index: {}]   ;;  %s167_s3 = inlined_call_operand.hbm [shape: f32[4,128], index: 3, kind: output, shape index: {}]  }
   0x1   :  { %9 = vsyncpa [#allocation4], 0  ;;  %s112_s12 = smov [#allocation2]   ;;  %s64_s16 = scalar_lea.hbm %s164_s0, 64 }
   0x2   :  { %s16_s13 = sshll.u32 %s112_s12, 4  ;;  %p65_p0 = scmp.ne.s32.totalorder %s164_s0, %s64_s16  ;;  %s17_s13 = int_to_ptr.vmem [resolvable:$true] %s16_s13 }
   0x3   :  { %p68_p1 = scmp.lt.u32.totalorder %s64_s16, %s164_s0 }
   0x5   :  { %p70_p2 = pnand %p68_p1, %p65_p0 }
   0x7   :  { %73 = shalt.err (!%p70_p2)
}
   0x8   :  { %s74_s21 = scalar_lea.vmem %s17_s13, 64  ;;  %p79_p4 = scmp.lt.s32.totalorder %s17_s13, %s17_s13 }
   0x9   :  { %p75_p3 = scmp.ne.s32.totalorder %s17_s13, %s74_s21  ;;  %p80_p5 = scmp.lt.s32.totalorder %s74_s21, %s74_s21 }
   0xb   :  { %p81_p6 = por %p80_p5, %p79_p4 }
   0xd   :  { %p82_p7 = pnand %p81_p6, %p75_p3 }
   0xf   :  { %85 = shalt.err (!%p82_p7)
}
  0x10   :  { %19 = dma.hbm_to_vmem [thread:$0]  %s164_s0, 64, %s17_s13, [#allocation3]  }
  0x11   :  { %108 = dma.done.wait [#allocation3], 64  }
  0x12   :  { %109 = vsyncadd [#allocation3], 4294967232  ;;  %s113_s24 = smov [#allocation5]   ;;  %v61_v0 = vld [vmem:[%s165_s1] ss:$0 sm:$0xff] }
  0x13   :  { %s51_s25 = sshll.u32 %s113_s24, 4  ;;  %v28_v1 = vld [vmem:[#allocation2] sm:$0xf]  ;;  %s52_s25 = int_to_ptr.vmem [resolvable:$true] %s51_s25 }
  0x14   :  { %v60_v2 = vld [vmem:[%s166_s2] ss:$0 sm:$0xff]  ;;  %s86_s30 = scalar_lea.vmem %s52_s25, 64  ;;  %p91_p9 = scmp.lt.s32.totalorder %s52_s25, %s52_s25 }
  0x15   :  { %v36_v3 = vmul.f32 %v60_v2, %v28_v1  ;;  %p87_p8 = scmp.ne.s32.totalorder %s52_s25, %s86_s30  ;;  %p92_p10 = scmp.lt.s32.totalorder %s86_s30, %s86_s30 }
  0x17   :  { %v43_v4 = vadd.f32 %v61_v0, %v36_v3  ;;  %p93_p11 = por %p92_p10, %p91_p9 }
  0x19   :  { %44 = vst [vmem:[#allocation5] sm:$0xf] %v43_v4  ;;  %p94_p12 = pnand %p93_p11, %p87_p8 }
  0x1b   :  { %97 = shalt.err (!%p94_p12)
}
  0x1c   :  { %s98_s1 = scalar_lea.hbm %s167_s3, 64 }
  0x1d   :  { %p99_p13 = scmp.ne.s32.totalorder %s167_s3, %s98_s1  ;;  %p102_p0 = scmp.lt.u32.totalorder %s98_s1, %s167_s3 }
  0x1f   :  { %p104_p1 = pnand %p102_p0, %p99_p13 }
  0x21   :  { %107 = shalt.err (!%p104_p1)
}
  0x22   :  { %54 = dma.vmem_to_hbm [thread:$0]  %s52_s25, 64, %s167_s3, [#allocation4]  }
  0x23   :  { %110 = dma.done.wait [#allocation4], 64  }
  0x24   :  { %111 = vsyncadd [#allocation4], 4294967232 }
  0x25   :  { %58 = vsyncpa [#allocation3], 1 }
  0x26   :  { %59 = vsyncpa [#allocation4], 1 }

</bundles_post_ra>
